<compile_context>
chip_gen: v5e
topology: v5e:2x2
jax: 0.10.0
libtpu: 0.0.40
codegen_flags: <defaults>
</compile_context>

<pallas_src>
import math
from functools import partial

import jax
import jax.numpy as jnp
from jax.experimental import pallas as pl
from jax.experimental.pallas import tpu as pltpu

HIDDEN = 64   # per-head hidden width (fc1 / fc3 output)


def _round_up(n, m):
    return ((n + m - 1) // m) * m


# ----------------------------------------------------------------------------
# Kernel: two fused matmuls + relu + sigmoid, all in VMEM.
#   h = relu(x @ W13 + b13)        [TB, 128]   (fc1 | fc3)
#   y = h @ W24 + b24              [TB, output_num+1]   (fc2 block / fc4 col)
#   prob  = sigmoid(y[:, :output_num])
#   value = y[:, output_num]
# ----------------------------------------------------------------------------
def _policy_net_kernel(x_ref, w13_ref, b13_ref, w24_ref, b24_ref,
                       value_ref, prob_ref, *, output_num):
    x = x_ref[...]

    h = jnp.dot(x, w13_ref[...], preferred_element_type=jnp.float32) + b13_ref[...]
    h = jnp.maximum(h, 0.0)

    y = jnp.dot(h, w24_ref[...], preferred_element_type=jnp.float32) + b24_ref[...]

    prob_ref[...] = jax.nn.sigmoid(y[:, :output_num]).astype(prob_ref.dtype)
    value_ref[...] = y[:, output_num:output_num + 1].astype(value_ref.dtype)


# ----------------------------------------------------------------------------
# One-time parameter fusion (layout plumbing, done once outside the hot path).
# Weights come in pre-transposed [in, out]; biases as [1, out].
# ----------------------------------------------------------------------------
def fuse_params(params, input_num, output_num):
    n_out = output_num + 1

    # W13: [input_num, 128] -- fc1 in cols 0:64, fc3 in cols 64:128.
    w13 = jnp.concatenate([params["w1"], params["w3"]], axis=1)
    b13 = jnp.concatenate([params["b1"], params["b3"]], axis=1)        # [1, 128]

    # W24: [128, output_num+1] block-diagonal -- fc2 upper-left, fc4 last col.
    w24 = jnp.zeros((2 * HIDDEN, n_out), jnp.float32)
    w24 = w24.at[:HIDDEN, :output_num].set(params["w2"])
    w24 = w24.at[HIDDEN:, output_num].set(params["w4"][:, 0])
    b24 = jnp.concatenate([params["b2"], params["b4"]], axis=1)        # [1, n_out]

    return {"w13": w13, "b13": b13, "w24": w24, "b24": b24}


# ----------------------------------------------------------------------------
# Wrapper: batched grid over B, weights VMEM-resident via constant index_maps.
# ----------------------------------------------------------------------------
def policy_net_forward(x, w13, b13, w24, b24, *, output_num, block_b=1024):
    """x: [B, input_num] f32.  Returns (value [B,1], action_prob [B,output_num])."""
    B, in_features = x.shape
    h_dim = w13.shape[1]          # 128
    n_out = w24.shape[1]          # output_num + 1

    # Batch tile: big enough to amortize per-grid-step overhead (sweep 512-2048),
    # but capped at ceil(B/2) (8-aligned) so large batches give >= 2 grid tiles
    # and the "parallel" axis can feed both TensorCores on v7x.
    tb = min(block_b, max(8, _round_up(pl.cdiv(B, 2), 8)))
    grid = (pl.cdiv(B, tb),)      # ragged tail handled by Pallas; no pad copy

    kernel = partial(_policy_net_kernel, output_num=output_num)

    flops = 2 * B * (in_features * h_dim + h_dim * n_out)
    bytes_accessed = 4 * (B * in_features                      # x
                          + in_features * h_dim + h_dim        # W13, b13
                          + h_dim * n_out + n_out              # W24, b24
                          + B * n_out)                         # value + prob
    cost = pl.CostEstimate(flops=flops,
                           transcendentals=B * output_num,
                           bytes_accessed=bytes_accessed)

    value, prob = pl.pallas_call(
        kernel,
        out_shape=(jax.ShapeDtypeStruct((B, 1), jnp.float32),
                   jax.ShapeDtypeStruct((B, output_num), jnp.float32)),
        grid=grid,
        in_specs=[
            # Activations: tiled over the batch grid axis, native feature width.
            pl.BlockSpec((tb, in_features), lambda i: (i, 0)),
            # Weights / biases: constant index_map -> stay VMEM-resident.
            pl.BlockSpec((in_features, h_dim), lambda i: (0, 0)),
            pl.BlockSpec((1, h_dim), lambda i: (0, 0)),
            pl.BlockSpec((h_dim, n_out), lambda i: (0, 0)),
            pl.BlockSpec((1, n_out), lambda i: (0, 0)),
        ],
        out_specs=(
            pl.BlockSpec((tb, 1), lambda i: (i, 0)),
            pl.BlockSpec((tb, output_num), lambda i: (i, 0)),
        ),
        compiler_params=pltpu.CompilerParams(
            dimension_semantics=("parallel",)),   # shards batch across v7x TCs
        cost_estimate=cost,
    )(x, w13, b13, w24, b24)

    return value, prob


# ----------------------------------------------------------------------------
# Deterministic parameter init (PyTorch nn.Linear default U(-1/sqrt(fan_in), ..)).
# Weights stored as [in, out]; biases as [1, out].
# ----------------------------------------------------------------------------
def init_policy_net_params(key, input_num, output_num):
    def linear(key, fan_in, fan_out):
        kw, kb = jax.random.split(key)
        bound = 1.0 / math.sqrt(fan_in)
        w = jax.random.uniform(kw, (fan_in, fan_out), jnp.float32, -bound, bound)
        b = jax.random.uniform(kb, (1, fan_out), jnp.float32, -bound, bound)
        return w, b

    k1, k2, k3, k4 = jax.random.split(key, 4)
    w1, b1 = linear(k1, input_num, HIDDEN)       # fc1
    w2, b2 = linear(k2, HIDDEN, output_num)      # fc2
    w3, b3 = linear(k3, input_num, HIDDEN)       # fc3
    w4, b4 = linear(k4, HIDDEN, 1)               # fc4
    return {"w1": w1, "b1": b1, "w2": w2, "b2": b2,
            "w3": w3, "b3": b3, "w4": w4, "b4": b4}


# Pure-JAX reference (un-fused params) for correctness checking.
def _forward_ref(x, p):
    h_v = jnp.maximum(x @ p["w3"] + p["b3"], 0.0)
    value = h_v @ p["w4"] + p["b4"]
    h_a = jnp.maximum(x @ p["w1"] + p["b1"], 0.0)
    prob = jax.nn.sigmoid(h_a @ p["w2"] + p["b2"])
    return value, prob


if __name__ == "__main__":
    B, INPUT_NUM, OUTPUT_NUM = 8, 32, 8

    key = jax.random.PRNGKey(0)
    k_params, k_x = jax.random.split(key)

    params = init_policy_net_params(k_params, INPUT_NUM, OUTPUT_NUM)
    x = jax.random.normal(k_x, (B, INPUT_NUM), jnp.float32)

    fused = fuse_params(params, INPUT_NUM, OUTPUT_NUM)

    fwd = jax.jit(policy_net_forward, static_argnames=("output_num", "block_b"))
    value, prob = fwd(x, fused["w13"], fused["b13"], fused["w24"], fused["b24"],
                      output_num=OUTPUT_NUM)
    value = jax.block_until_ready(value)
    prob = jax.block_until_ready(prob)

    value_ref, prob_ref = _forward_ref(x, params)
    assert value.shape == (B, 1) and prob.shape == (B, OUTPUT_NUM)
    assert jnp.allclose(value, value_ref, atol=1e-5, rtol=1e-5)
    assert jnp.allclose(prob, prob_ref, atol=1e-5, rtol=1e-5)

    print("KERNEL_OK")
</pallas_src>

<mosaic_0001>
module attributes {stable_mosaic.version = 11 : i64} {
  func.func @_policy_net_kernel(%arg0: i32, %arg1: memref<8x32xf32, #tpu.memory_space<vmem>>, %arg2: memref<32x128xf32, #tpu.memory_space<vmem>>, %arg3: memref<1x128xf32, #tpu.memory_space<vmem>>, %arg4: memref<128x9xf32, #tpu.memory_space<vmem>>, %arg5: memref<1x9xf32, #tpu.memory_space<vmem>>, %arg6: memref<8x1xf32, #tpu.memory_space<vmem>>, %arg7: memref<8x8xf32, #tpu.memory_space<vmem>>) attributes {dimension_semantics = [#tpu.dimension_semantics<parallel>], iteration_bounds = array<i64: 1>, scalar_prefetch = 0 : i64, scratch_operands = 0 : i64, tpu.core_type = #tpu.core_type<tc>, window_params = [{transform_indices = @transform_0, window_bounds = array<i64: 8, 32>}, {pipeline_mode = #tpu.pipeline_mode<synchronous>, transform_indices = @transform_1, window_bounds = array<i64: 32, 128>}, {pipeline_mode = #tpu.pipeline_mode<synchronous>, transform_indices = @transform_2, window_bounds = array<i64: 1, 128>}, {pipeline_mode = #tpu.pipeline_mode<synchronous>, transform_indices = @transform_3, window_bounds = array<i64: 128, 9>}, {pipeline_mode = #tpu.pipeline_mode<synchronous>, transform_indices = @transform_4, window_bounds = array<i64: 1, 9>}, {transform_indices = @transform_5, window_bounds = array<i64: 8, 1>}, {transform_indices = @transform_6, window_bounds = array<i64: 8, 8>}]} {
    %c0 = arith.constant 0 : index
    %c0_0 = arith.constant 0 : index
    %0 = vector.load %arg1[%c0, %c0_0] : memref<8x32xf32, #tpu.memory_space<vmem>>, vector<8x32xf32>
    %c0_1 = arith.constant 0 : index
    %c0_2 = arith.constant 0 : index
    %1 = vector.load %arg2[%c0_1, %c0_2] : memref<32x128xf32, #tpu.memory_space<vmem>>, vector<32x128xf32>
    %cst = arith.constant dense<0.000000e+00> : vector<8x128xf32>
    %2 = tpu.matmul %0, %1, %cst {dimension_numbers = #tpu.dot_dimension_numbers<[1], [0], [0], [1], [0, 0, 1, 1], [], []>} : vector<8x32xf32>, vector<32x128xf32>, vector<8x128xf32> -> vector<8x128xf32>
    %c0_3 = arith.constant 0 : index
    %c0_4 = arith.constant 0 : index
    %3 = vector.load %arg3[%c0_3, %c0_4] : memref<1x128xf32, #tpu.memory_space<vmem>>, vector<1x128xf32>
    %4 = vector.broadcast %3 : vector<1x128xf32> to vector<8x128xf32>
    %5 = arith.addf %2, %4 : vector<8x128xf32>
    %cst_5 = arith.constant 0.000000e+00 : f32
    %6 = vector.broadcast %cst_5 : f32 to vector<8x128xf32>
    %7 = arith.maximumf %5, %6 : vector<8x128xf32>
    %c0_6 = arith.constant 0 : index
    %c0_7 = arith.constant 0 : index
    %8 = vector.load %arg4[%c0_6, %c0_7] : memref<128x9xf32, #tpu.memory_space<vmem>>, vector<128x9xf32>
    %cst_8 = arith.constant dense<0.000000e+00> : vector<8x9xf32>
    %9 = tpu.matmul %7, %8, %cst_8 {dimension_numbers = #tpu.dot_dimension_numbers<[1], [0], [0], [1], [0, 0, 1, 1], [], []>} : vector<8x128xf32>, vector<128x9xf32>, vector<8x9xf32> -> vector<8x9xf32>
    %c0_9 = arith.constant 0 : index
    %c0_10 = arith.constant 0 : index
    %10 = vector.load %arg5[%c0_9, %c0_10] : memref<1x9xf32, #tpu.memory_space<vmem>>, vector<1x9xf32>
    %11 = vector.broadcast %10 : vector<1x9xf32> to vector<8x9xf32>
    %12 = arith.addf %9, %11 : vector<8x9xf32>
    %13 = vector.extract_strided_slice %12 {offsets = [0, 0], sizes = [8, 8], strides = [1, 1]} : vector<8x9xf32> to vector<8x8xf32>
    %14 = arith.negf %13 : vector<8x8xf32>
    %15 = math.exp %14 : vector<8x8xf32>
    %cst_11 = arith.constant 1.000000e+00 : f32
    %16 = vector.broadcast %cst_11 : f32 to vector<8x8xf32>
    %17 = arith.addf %16, %15 : vector<8x8xf32>
    %18 = arith.divf %16, %17 : vector<8x8xf32>
    %c0_12 = arith.constant 0 : index
    %c0_13 = arith.constant 0 : index
    %19 = vector.load %arg7[%c0_12, %c0_13] : memref<8x8xf32, #tpu.memory_space<vmem>>, vector<8x8xf32>
    tpu.vector_store %arg7[%c0_12, %c0_13], %18 {strides = array<i32>} : memref<8x8xf32, #tpu.memory_space<vmem>>, vector<8x8xf32>,
    %20 = vector.extract_strided_slice %12 {offsets = [0, 8], sizes = [8, 1], strides = [1, 1]} : vector<8x9xf32> to vector<8x1xf32>
    %c0_14 = arith.constant 0 : index
    %c0_15 = arith.constant 0 : index
    %21 = vector.load %arg6[%c0_14, %c0_15] : memref<8x1xf32, #tpu.memory_space<vmem>>, vector<8x1xf32>
    tpu.vector_store %arg6[%c0_14, %c0_15], %20 {strides = array<i32>} : memref<8x1xf32, #tpu.memory_space<vmem>>, vector<8x1xf32>,
    return
  }
  func.func @transform_0(%arg0: i32) -> (i32, i32) {
    %c0_i32 = arith.constant 0 : i32
    %c0_i32_0 = arith.constant 0 : i32
    return %arg0, %c0_i32 : i32, i32
  }
  func.func @transform_1(%arg0: i32) -> (i32, i32) {
    %c0_i32 = arith.constant 0 : i32
    %c0_i32_0 = arith.constant 0 : i32
    %c0_i32_1 = arith.constant 0 : i32
    return %c0_i32, %c0_i32_0 : i32, i32
  }
  func.func @transform_2(%arg0: i32) -> (i32, i32) {
    %c0_i32 = arith.constant 0 : i32
    %c0_i32_0 = arith.constant 0 : i32
    %c0_i32_1 = arith.constant 0 : i32
    return %c0_i32, %c0_i32_0 : i32, i32
  }
  func.func @transform_3(%arg0: i32) -> (i32, i32) {
    %c0_i32 = arith.constant 0 : i32
    %c0_i32_0 = arith.constant 0 : i32
    %c0_i32_1 = arith.constant 0 : i32
    return %c0_i32, %c0_i32_0 : i32, i32
  }
  func.func @transform_4(%arg0: i32) -> (i32, i32) {
    %c0_i32 = arith.constant 0 : i32
    %c0_i32_0 = arith.constant 0 : i32
    %c0_i32_1 = arith.constant 0 : i32
    return %c0_i32, %c0_i32_0 : i32, i32
  }
  func.func @transform_5(%arg0: i32) -> (i32, i32) {
    %c0_i32 = arith.constant 0 : i32
    %c0_i32_0 = arith.constant 0 : i32
    return %arg0, %c0_i32 : i32, i32
  }
  func.func @transform_6(%arg0: i32) -> (i32, i32) {
    %c0_i32 = arith.constant 0 : i32
    %c0_i32_0 = arith.constant 0 : i32
    return %arg0, %c0_i32 : i32, i32
  }
}

</mosaic_0001>

<bundles_post_ra>
// kernel: policy_net_forward.1
= control target key start
LH: loop header
LB: loop body
LE: loop exit
PB: predicated region body
PF: predicated region fallthrough
CT: control target
= control target key end

     0   :  { %vm32_vm0 = vcmask 261120   ;;  %s292_s0 = inlined_call_operand.vmem [shape: f32[8,32], index: 0, kind: input, shape index: {}]   ;;  %s293_s1 = inlined_call_operand.vmem [shape: f32[32,128], index: 1, kind: input, shape index: {}]   ;;  %s294_s2 = inlined_call_operand.vmem [shape: f32[1,128], index: 2, kind: input, shape index: {}]   ;;  %s295_s3 = inlined_call_operand.vmem [shape: f32[128,9], index: 3, kind: input, shape index: {}]   ;;  %s296_s4 = inlined_call_operand.vmem [shape: f32[1,9], index: 4, kind: input, shape index: {}]   ;;  %s297_s5 = inlined_call_operand.vmem [shape: f32[8,1], index: 5, kind: output, shape index: {0}]   ;;  %s298_s6 = inlined_call_operand.hbm [shape: f32[8,8], index: 6, kind: output, shape index: {1}]  }
   0x1   :  { %v27_v0 = vld [vmem:[%s293_s1 + $0x18] sm:$0xff]  ;;  %v26_v1 = vld [vmem:[%s293_s1 + $0x10] sm:$0xff]  ;;  %v25_v3 = vld [vmem:[%s293_s1 + $0x8] sm:$0xff] }
   0x2   :  { %48 = vmatpush.msra.mxu0 %v27_v0  ;;  %v72_v2 = vld [vmem:[%s295_s3 + $0x78] sm:$0xff]  ;;  %v71_v4 = vld [vmem:[%s295_s3 + $0x70] sm:$0xff]  ;;  %v70_v5 = vld [vmem:[%s295_s3 + $0x68] sm:$0xff] }
   0x3   :  { %77 = vmatpush.msra.mxu1 %v72_v2  ;;  %v24_v6 = vld [vmem:[%s293_s1] sm:$0xff]  ;;  %v68_v9 = vld [vmem:[%s295_s3 + $0x58] sm:$0xff] }
   0x4   :  { %49 = vmatpush.msra.mxu0 %v26_v1  ;;  %v23_v7 = vld [vmem:[%s292_s0] sm:$0xff] }
   0x5   :  { %78 = vmatpush.msra.mxu1 %v71_v4  ;;  %v69_v8 = vld [vmem:[%s295_s3 + $0x60] sm:$0xff] }
   0x6   :  { %50 = vmatpush.msra.mxu0 %v25_v3 }
   0x7   :  { %79 = vmatpush.msra.mxu1 %v70_v5 }
   0x8   :  { %51 = vmatpush.msra.mxu0 %v24_v6 }
   0x9   :  { %12 = vsyncpa [#allocation3], 0  ;;  %144 = vmatmul.msk.f32.vlgmr.msra.gmra.mxu0 %vm32_vm0, %v23_v7  ;;  %80 = vmatpush.msra.mxu1 %v69_v8  ;;  %v67_v10 = vld [vmem:[%s295_s3 + $0x50] sm:$0xff]  ;;  %v66_v11 = vld [vmem:[%s295_s3 + $0x48] sm:$0xff]  ;;  %s180_s1 = smov 120   ;;  %s133_s0 = sshll.u32 %s298_s6, 4  ;;  %s134_s0 = int_to_ptr.hbm [resolvable:$true] %s133_s0 }
   0xa   :  { %v65_v12 = vld [vmem:[%s295_s3 + $0x40] sm:$0xff]  ;;  %v64_v13 = vld [vmem:[%s295_s3 + $0x38] sm:$0xff]  ;;  %v63_v14 = vld [vmem:[%s295_s3 + $0x30] sm:$0xff]  ;;  %vm116_vm4 = vcmask 64512   ;;  %vm122_vm6 = vcmask 7168  }
   0xb   :  { %81 = vmatpush.msra.mxu1 %v68_v9  ;;  %v62_v15 = vld [vmem:[%s295_s3 + $0x28] sm:$0xff]  ;;  %v61_v16 = vld [vmem:[%s295_s3 + $0x20] sm:$0xff]  ;;  %v60_v17 = vld [vmem:[%s295_s3 + $0x18] sm:$0xff] }
   0xc   :  { %v59_v18 = vld [vmem:[%s295_s3 + $0x10] sm:$0xff]  ;;  %v58_v19 = vld [vmem:[%s295_s3 + $0x8] sm:$0xff]  ;;  %v57_v20 = vld [vmem:[%s295_s3] sm:$0xff] }
   0xd   :  { %82 = vmatpush.msra.mxu1 %v67_v10  ;;  %v148_v21 = vld [vmem:[%s294_s2] ss:$0 sm:$0xff]  ;;  %s181_s2 = smov [#allocation2]  }
   0xe   :  { %v149_v25 = vld [vmem:[%s296_s4] ss:$0 sm:$0xff]  ;;  %s131_s3 = sshll.u32 %s181_s2, 4  ;;  %s132_s3 = int_to_ptr.vmem [resolvable:$true] %s131_s3 }
   0xf   :  { %83 = vmatpush.msra.mxu1 %v66_v11 }
  0x11   :  { %84 = vmatpush.msra.mxu1 %v65_v12 }
  0x13   :  { %85 = vmatpush.msra.mxu1 %v64_v13 }
  0x15   :  { %86 = vmatpush.msra.mxu1 %v63_v14 }
  0x17   :  { %87 = vmatpush.msra.mxu1 %v62_v15 }
  0x19   :  { %88 = vmatpush.msra.mxu1 %v61_v16 }
  0x1b   :  { %89 = vmatpush.msra.mxu1 %v60_v17 }
  0x1d   :  { %90 = vmatpush.msra.mxu1 %v59_v18 }
  0x1f   :  { %91 = vmatpush.msra.mxu1 %v58_v19 }
  0x21   :  { %92 = vmatpush.msra.mxu1 %v57_v20 }
  0x86   :  { %v53_v22 = vpop.f32.mrf.mxu0 }
  0x87   :  { %v54_v23 = vadd.f32 %v148_v21, %v53_v22 }
  0x89   :  { %v56_v24 = vmax.f32 %v54_v23, 0.0 }
  0x8b   :  { %93 = vmatmul.f32.vlgmr.msra.gmra.mxu1 %v56_v24 }
 0x108   :  { %v94_v26 = vpop.f32.mrf.mxu1 }
 0x109   :  { %v95_v27 = vadd.f32 %v149_v25, %v94_v26 }
 0x10b   :  { %v145_v28 = vmul.f32 -1.442695, %v95_v27  ;;  %119 = vrot.lane.b32.xlu0 %v95_v27, %s180_s1 }
 0x10d   :  { %150 = vpow2.f32 %v145_v28 }
 0x113   :  { %v151_v29 = vpop.eup %150 }
 0x114   :  { %v100_v30 = vadd.f32 1.0, %v151_v29 }
 0x116   :  { %152 = vrcp.f32 %v100_v30  ;;  %v112_v34 = vand.u32 2147483648, %v100_v30  ;;  %v110_v36 = vand.u32 2147483647, %v100_v30  ;;  %vm106_vm2 = vweird.f32 %v100_v30 }
 0x118   :  { %v113_v38 = vor.u32 1.1754944e-38, %v112_v34  ;;  %vm111_vm5 = vcmp.eq.f32.partialorder %v110_v36, 8.507059e+37 }
 0x11c   :  { %v153_v31 = vpop.eup %152 }
 0x11d   :  { %v102_v32 = vmul.f32 %v153_v31, %v100_v30  ;;  %vm107_vm1 = vweird.f32 %v153_v31 }
 0x11e   :  { %vm108_vm3 = vmor %vm106_vm2, %vm107_vm1 }
 0x11f   :  { %v103_v33 = vsub.f32 1.0, %v102_v32 }
 0x121   :  { %v104_v35 = vmul.f32 %v153_v31, %v103_v33 }
 0x123   :  { %v105_v37 = vadd.f32 %v153_v31, %v104_v35 }
 0x125   :  { %v109_v39 = vsel %vm108_vm3, %v153_v31, %v105_v37 }
 0x126   :  { %v114_v40 = vsel %vm111_vm5, %v113_v38, %v109_v39 }
 0x127   :  { %117 = vst.msk [vmem:[#allocation2] sm:$0xff] %vm116_vm4, %v114_v40 }
 0x128   :  { %136 = dma.vmem_to_hbm [thread:$0]  %s132_s3, 128, %s134_s0, [#allocation3]  }
 0x17d   :  { %v120_v41 = vpop.permute.xlu0 %119 }
 0x17e   :  { %123 = vst.msk [vmem:[%s297_s5] sm:$0xff] %vm122_vm6, %v120_v41 }
 0x17f   :  { %178 = dma.done.wait [#allocation3], 128  }
 0x180   :  { %179 = vsyncadd [#allocation3], 4294967168 }
 0x181   :  { %143 = vsyncpa [#allocation3], 1 }

</bundles_post_ra>
